<compile_context>
chip_gen: v5e
topology: v5e:2x2
jax: 0.10.0
libtpu: 0.0.40
codegen_flags: <defaults>
</compile_context>

<pallas_src>
import jax
import jax.numpy as jnp
from jax.experimental import pallas as pl
from jax.experimental.pallas import tpu as pltpu

_EPS = 1e-5
_LANE = 128        # lane padding for correctness / lane-dense stores
_MXU_TILE = 256    # preferred N/K tile multiple for v6e/v7x MXU in the tiled variant


def _round_up(n, m):
    return ((n + m - 1) // m) * m


def _linear_bn_relu(h_bf16, w_ref, gamma, beta):
    """Linear (no bias: cancelled by BN) -> BatchNorm1d(train) -> ReLU."""
    # MXU: bf16 x bf16 -> f32 accumulation.
    y = jnp.dot(h_bf16, w_ref[...], preferred_element_type=jnp.float32)
    n = y.shape[-1]
    # One cross-sublane (XLU) reduce for both BN statistics: mean([y | y*y]).
    stats = jnp.mean(jnp.concatenate([y, y * y], axis=-1), axis=0, keepdims=True)
    mean = stats[:, :n]
    # E[y^2] - E[y]^2 with clamp; safe here (biases dropped, symmetric init).
    # The batch-tiled variant should use a two-pass / Welford form instead.
    var = jnp.maximum(stats[:, n:] - mean * mean, 0.0)
    # Fold gamma/beta into one scale/shift -> single wide fused mul+add (+relu).
    scale = gamma * jax.lax.rsqrt(var + _EPS)
    shift = beta - mean * scale
    h = jnp.maximum(y * scale + shift, 0.0)
    return h.astype(jnp.bfloat16)


def batch_net_kernel(x_ref, w1_ref, w2_ref, w3_ref, w4_ref, vec_ref, o_ref):
    # x_ref: [B, in_dim] f32 (unpadded); wN_ref: [P_in, P_out] bf16
    # (pre-transposed/padded); vec_ref: [8, Pmax] f32 packed as
    # (g1, be1, g2, be2, g3, be3, b4, 0).
    vec = vec_ref[...]
    p1 = w1_ref.shape[1]
    p2 = w2_ref.shape[1]
    p3 = w3_ref.shape[1]
    p4 = w4_ref.shape[1]

    # Cast + lane-pad x inside the kernel (no wrapper-side padded HBM copy).
    x = x_ref[...].astype(jnp.bfloat16)
    kpad = w1_ref.shape[0] - x.shape[-1]
    if kpad:
        x = jnp.concatenate(
            [x, jnp.zeros((x.shape[0], kpad), jnp.bfloat16)], axis=-1)

    h = _linear_bn_relu(x, w1_ref, vec[0:1, :p1], vec[1:2, :p1])
    h = _linear_bn_relu(h, w2_ref, vec[2:3, :p2], vec[3:4, :p2])
    h = _linear_bn_relu(h, w3_ref, vec[4:5, :p3], vec[5:6, :p3])
    out = jnp.dot(h, w4_ref[...], preferred_element_type=jnp.float32)
    # TODO(synk): emit bf16 (consumer dtype) here to halve writeback at large B.
    o_ref[...] = out + vec[6:7, :p4]


def prepare_params(params):
    """One-time (outside the hot path) transpose / pad / bf16-cast of weights
    and packing of all 1-D params into a single (8, Pmax) f32 array.

    params = (w1,b1,g1,be1, w2,b2,g2,be2, w3,b3,g3,be3, w4,b4) in PyTorch layout.
    b1/b2/b3 are intentionally dropped (cancelled by the following BatchNorm,
    training mode only).
    """
    (w1, _b1, g1, be1, w2, _b2, g2, be2, w3, _b3, g3, be3, w4, b4) = params

    def pad_w(w):  # (out, in) torch layout -> padded (in_p, out_p), bf16
        o, i = w.shape
        wp = jnp.zeros((_round_up(i, _LANE), _round_up(o, _LANE)), jnp.float32)
        wp = wp.at[:i, :o].set(w.T.astype(jnp.float32))
        return wp.astype(jnp.bfloat16)

    w1p, w2p, w3p, w4p = pad_w(w1), pad_w(w2), pad_w(w3), pad_w(w4)
    pmax = max(w1p.shape[1], w2p.shape[1], w3p.shape[1], w4p.shape[1])

    def row(v):  # zero-pad to pmax lanes (zeros keep padded lanes inert)
        r = jnp.zeros((pmax,), jnp.float32)
        return r.at[: v.shape[0]].set(v.astype(jnp.float32))

    vec = jnp.stack([row(g1), row(be1), row(g2), row(be2),
                     row(g3), row(be3), row(b4),
                     jnp.zeros((pmax,), jnp.float32)])  # (8, pmax) = one tile
    return (w1p, w2p, w3p, w4p, vec), int(w4.shape[0])


def batch_net_forward(x, prepared, out_dim):
    """x: [B, in_dim] f32. prepared: output of prepare_params."""
    w1p, w2p, w3p, w4p, vec = prepared
    B, in_dim = x.shape
    out_p = w4p.shape[1]
    pmax = vec.shape[1]

    args = (x, w1p, w2p, w3p, w4p, vec)

    # Single-buffered, whole-array-in-VMEM operands: no grid -> no pipeline
    # buffers, so peak VMEM is ~1x the operand footprint (not ~2x).
    vmem_spec = pl.BlockSpec(memory_space=pltpu.MemorySpace.VMEM)

    def nbytes(a):
        return a.size * a.dtype.itemsize

    weight_bytes = sum(nbytes(w) for w in (w1p, w2p, w3p, w4p)) + nbytes(vec)
    io_bytes = nbytes(x) + B * out_p * 4
    act_bytes = 4 * B * pmax * 4  # rough upper bound on live f32 intermediates
    vmem_bytes = int(2 * (weight_bytes + io_bytes + act_bytes)) + (1 << 20)
    vmem_bytes = min(max(vmem_bytes, 4 << 20), 64 << 20)  # v7x physical cap

    flops = 2 * B * sum(w.shape[0] * w.shape[1] for w in (w1p, w2p, w3p, w4p))
    transcendentals = w1p.shape[1] + w2p.shape[1] + w3p.shape[1]  # rsqrt per BN feat
    cost = pl.CostEstimate(flops=flops,
                           transcendentals=transcendentals,
                           bytes_accessed=weight_bytes + io_bytes)

    out = pl.pallas_call(
        batch_net_kernel,
        out_shape=jax.ShapeDtypeStruct((B, out_p), jnp.float32),
        in_specs=[vmem_spec] * len(args),
        out_specs=vmem_spec,
        compiler_params=pltpu.CompilerParams(vmem_limit_bytes=vmem_bytes),
        cost_estimate=cost,
    )(*args)
    return out[:, :out_dim]


def batch_net_reference(x, params, eps=_EPS):
    (w1, b1, g1, be1, w2, b2, g2, be2, w3, b3, g3, be3, w4, b4) = params

    def block(h, w, b, g, be):
        y = h @ w.T + b
        mean = jnp.mean(y, axis=0, keepdims=True)
        var = jnp.mean((y - mean) ** 2, axis=0, keepdims=True)
        y = (y - mean) / jnp.sqrt(var + eps)
        return jnp.maximum(y * g + be, 0.0)

    h = block(x, w1, b1, g1, be1)
    h = block(h, w2, b2, g2, be2)
    h = block(h, w3, b3, g3, be3)
    return h @ w4.T + b4


def init_params(key, in_dim, h1, h2, h3, out_dim):
    ks = jax.random.split(key, 8)
    dims = [(h1, in_dim), (h2, h1), (h3, h2), (out_dim, h3)]
    params = []
    for i, (o, ii) in enumerate(dims):
        bound = 1.0 / jnp.sqrt(ii)
        w = jax.random.uniform(ks[2 * i], (o, ii), jnp.float32, -bound, bound)
        b = jax.random.uniform(ks[2 * i + 1], (o,), jnp.float32, -bound, bound)
        params.append(w)
        params.append(b)
        if i < 3:  # BatchNorm1d affine params (gamma=1, beta=0 at init)
            params.append(jnp.ones((o,), jnp.float32))
            params.append(jnp.zeros((o,), jnp.float32))
    return tuple(params)


if __name__ == "__main__":
    key = jax.random.PRNGKey(0)
    kx, kp = jax.random.split(key)

    B, in_dim, h1, h2, h3, out_dim = 16, 32, 64, 64, 32, 16
    x = jax.random.normal(kx, (B, in_dim), jnp.float32)
    params = init_params(kp, in_dim, h1, h2, h3, out_dim)

    prepared, out_d = prepare_params(params)          # one-time prep
    out = batch_net_forward(x, prepared, out_d)
    out = jax.block_until_ready(out)

    ref = batch_net_reference(x, params)
    assert out.shape == (B, out_dim)
    # bf16 MXU operands / bf16 inter-layer activations (f32 accumulation and
    # f32 BN stats) -> intentional precision loss, hence loosened tolerance.
    assert jnp.allclose(out, ref, atol=5e-2, rtol=5e-2), "mismatch vs reference"

    print("KERNEL_OK")
</pallas_src>

<mosaic_0001>
module attributes {stable_mosaic.version = 11 : i64} {
  func.func @batch_net_kernel(%arg0: memref<16x32xf32, #tpu.memory_space<vmem>>, %arg1: memref<128x128xbf16, #tpu.memory_space<vmem>>, %arg2: memref<128x128xbf16, #tpu.memory_space<vmem>>, %arg3: memref<128x128xbf16, #tpu.memory_space<vmem>>, %arg4: memref<128x128xbf16, #tpu.memory_space<vmem>>, %arg5: memref<8x128xf32, #tpu.memory_space<vmem>>, %arg6: memref<16x128xf32, #tpu.memory_space<vmem>>) attributes {dimension_semantics = [], scalar_prefetch = 0 : i64, scratch_operands = 0 : i64, tpu.core_type = #tpu.core_type<tc>} {
    %c0 = arith.constant 0 : index
    %c0_0 = arith.constant 0 : index
    %0 = vector.load %arg5[%c0, %c0_0] : memref<8x128xf32, #tpu.memory_space<vmem>>, vector<8x128xf32>
    %c0_1 = arith.constant 0 : index
    %c0_2 = arith.constant 0 : index
    %1 = vector.load %arg0[%c0_1, %c0_2] : memref<16x32xf32, #tpu.memory_space<vmem>>, vector<16x32xf32>
    %2 = arith.truncf %1 : vector<16x32xf32> to vector<16x32xbf16>
    %cst = arith.constant 0.000000e+00 : bf16
    %3 = vector.broadcast %cst : bf16 to vector<16x96xbf16>
    %4 = tpu.concatenate %2, %3 in 1 : vector<16x32xbf16>, vector<16x96xbf16> -> vector<16x128xbf16>
    %5 = vector.extract_strided_slice %0 {offsets = [0, 0], sizes = [1, 128], strides = [1, 1]} : vector<8x128xf32> to vector<1x128xf32>
    %6 = vector.extract_strided_slice %0 {offsets = [1, 0], sizes = [1, 128], strides = [1, 1]} : vector<8x128xf32> to vector<1x128xf32>
    %c0_3 = arith.constant 0 : index
    %c0_4 = arith.constant 0 : index
    %7 = vector.load %arg1[%c0_3, %c0_4] : memref<128x128xbf16, #tpu.memory_space<vmem>>, vector<128x128xbf16>
    %cst_5 = arith.constant dense<0.000000e+00> : vector<16x128xf32>
    %8 = tpu.matmul %4, %7, %cst_5 {dimension_numbers = #tpu.dot_dimension_numbers<[1], [0], [0], [1], [0, 0, 1, 1], [], []>} : vector<16x128xbf16>, vector<128x128xbf16>, vector<16x128xf32> -> vector<16x128xf32>
    %9 = arith.mulf %8, %8 : vector<16x128xf32>
    %10 = tpu.concatenate %8, %9 in 1 : vector<16x128xf32>, vector<16x128xf32> -> vector<16x256xf32>
    %cst_6 = arith.constant dense<0.000000e+00> : vector<256xf32>
    %11 = vector.multi_reduction <add>, %10, %cst_6 [0] : vector<16x256xf32> to vector<256xf32>
    %12 = vector.shape_cast %11 : vector<256xf32> to vector<1x256xf32>
    %cst_7 = arith.constant 1.600000e+01 : f32
    %13 = vector.broadcast %cst_7 : f32 to vector<1x256xf32>
    %14 = arith.divf %12, %13 : vector<1x256xf32>
    %15 = vector.extract_strided_slice %14 {offsets = [0, 0], sizes = [1, 128], strides = [1, 1]} : vector<1x256xf32> to vector<1x128xf32>
    %16 = vector.extract_strided_slice %14 {offsets = [0, 128], sizes = [1, 128], strides = [1, 1]} : vector<1x256xf32> to vector<1x128xf32>
    %17 = arith.mulf %15, %15 : vector<1x128xf32>
    %18 = arith.subf %16, %17 : vector<1x128xf32>
    %cst_8 = arith.constant 0.000000e+00 : f32
    %19 = vector.broadcast %cst_8 : f32 to vector<1x128xf32>
    %20 = arith.maximumf %18, %19 : vector<1x128xf32>
    %cst_9 = arith.constant 9.99999974E-6 : f32
    %21 = vector.broadcast %cst_9 : f32 to vector<1x128xf32>
    %22 = arith.addf %20, %21 : vector<1x128xf32>
    %23 = math.rsqrt %22 : vector<1x128xf32>
    %24 = arith.mulf %5, %23 : vector<1x128xf32>
    %25 = arith.mulf %15, %24 : vector<1x128xf32>
    %26 = arith.subf %6, %25 : vector<1x128xf32>
    %27 = vector.broadcast %24 : vector<1x128xf32> to vector<16x128xf32>
    %28 = arith.mulf %8, %27 : vector<16x128xf32>
    %29 = vector.broadcast %26 : vector<1x128xf32> to vector<16x128xf32>
    %30 = arith.addf %28, %29 : vector<16x128xf32>
    %cst_10 = arith.constant 0.000000e+00 : f32
    %31 = vector.broadcast %cst_10 : f32 to vector<16x128xf32>
    %32 = arith.maximumf %30, %31 : vector<16x128xf32>
    %33 = arith.truncf %32 : vector<16x128xf32> to vector<16x128xbf16>
    %34 = vector.extract_strided_slice %0 {offsets = [2, 0], sizes = [1, 128], strides = [1, 1]} : vector<8x128xf32> to vector<1x128xf32>
    %35 = vector.extract_strided_slice %0 {offsets = [3, 0], sizes = [1, 128], strides = [1, 1]} : vector<8x128xf32> to vector<1x128xf32>
    %c0_11 = arith.constant 0 : index
    %c0_12 = arith.constant 0 : index
    %36 = vector.load %arg2[%c0_11, %c0_12] : memref<128x128xbf16, #tpu.memory_space<vmem>>, vector<128x128xbf16>
    %cst_13 = arith.constant dense<0.000000e+00> : vector<16x128xf32>
    %37 = tpu.matmul %33, %36, %cst_13 {dimension_numbers = #tpu.dot_dimension_numbers<[1], [0], [0], [1], [0, 0, 1, 1], [], []>} : vector<16x128xbf16>, vector<128x128xbf16>, vector<16x128xf32> -> vector<16x128xf32>
    %38 = arith.mulf %37, %37 : vector<16x128xf32>
    %39 = tpu.concatenate %37, %38 in 1 : vector<16x128xf32>, vector<16x128xf32> -> vector<16x256xf32>
    %cst_14 = arith.constant dense<0.000000e+00> : vector<256xf32>
    %40 = vector.multi_reduction <add>, %39, %cst_14 [0] : vector<16x256xf32> to vector<256xf32>
    %41 = vector.shape_cast %40 : vector<256xf32> to vector<1x256xf32>
    %cst_15 = arith.constant 1.600000e+01 : f32
    %42 = vector.broadcast %cst_15 : f32 to vector<1x256xf32>
    %43 = arith.divf %41, %42 : vector<1x256xf32>
    %44 = vector.extract_strided_slice %43 {offsets = [0, 0], sizes = [1, 128], strides = [1, 1]} : vector<1x256xf32> to vector<1x128xf32>
    %45 = vector.extract_strided_slice %43 {offsets = [0, 128], sizes = [1, 128], strides = [1, 1]} : vector<1x256xf32> to vector<1x128xf32>
    %46 = arith.mulf %44, %44 : vector<1x128xf32>
    %47 = arith.subf %45, %46 : vector<1x128xf32>
    %cst_16 = arith.constant 0.000000e+00 : f32
    %48 = vector.broadcast %cst_16 : f32 to vector<1x128xf32>
    %49 = arith.maximumf %47, %48 : vector<1x128xf32>
    %cst_17 = arith.constant 9.99999974E-6 : f32
    %50 = vector.broadcast %cst_17 : f32 to vector<1x128xf32>
    %51 = arith.addf %49, %50 : vector<1x128xf32>
    %52 = math.rsqrt %51 : vector<1x128xf32>
    %53 = arith.mulf %34, %52 : vector<1x128xf32>
    %54 = arith.mulf %44, %53 : vector<1x128xf32>
    %55 = arith.subf %35, %54 : vector<1x128xf32>
    %56 = vector.broadcast %53 : vector<1x128xf32> to vector<16x128xf32>
    %57 = arith.mulf %37, %56 : vector<16x128xf32>
    %58 = vector.broadcast %55 : vector<1x128xf32> to vector<16x128xf32>
    %59 = arith.addf %57, %58 : vector<16x128xf32>
    %cst_18 = arith.constant 0.000000e+00 : f32
    %60 = vector.broadcast %cst_18 : f32 to vector<16x128xf32>
    %61 = arith.maximumf %59, %60 : vector<16x128xf32>
    %62 = arith.truncf %61 : vector<16x128xf32> to vector<16x128xbf16>
    %63 = vector.extract_strided_slice %0 {offsets = [4, 0], sizes = [1, 128], strides = [1, 1]} : vector<8x128xf32> to vector<1x128xf32>
    %64 = vector.extract_strided_slice %0 {offsets = [5, 0], sizes = [1, 128], strides = [1, 1]} : vector<8x128xf32> to vector<1x128xf32>
    %c0_19 = arith.constant 0 : index
    %c0_20 = arith.constant 0 : index
    %65 = vector.load %arg3[%c0_19, %c0_20] : memref<128x128xbf16, #tpu.memory_space<vmem>>, vector<128x128xbf16>
    %cst_21 = arith.constant dense<0.000000e+00> : vector<16x128xf32>
    %66 = tpu.matmul %62, %65, %cst_21 {dimension_numbers = #tpu.dot_dimension_numbers<[1], [0], [0], [1], [0, 0, 1, 1], [], []>} : vector<16x128xbf16>, vector<128x128xbf16>, vector<16x128xf32> -> vector<16x128xf32>
    %67 = arith.mulf %66, %66 : vector<16x128xf32>
    %68 = tpu.concatenate %66, %67 in 1 : vector<16x128xf32>, vector<16x128xf32> -> vector<16x256xf32>
    %cst_22 = arith.constant dense<0.000000e+00> : vector<256xf32>
    %69 = vector.multi_reduction <add>, %68, %cst_22 [0] : vector<16x256xf32> to vector<256xf32>
    %70 = vector.shape_cast %69 : vector<256xf32> to vector<1x256xf32>
    %cst_23 = arith.constant 1.600000e+01 : f32
    %71 = vector.broadcast %cst_23 : f32 to vector<1x256xf32>
    %72 = arith.divf %70, %71 : vector<1x256xf32>
    %73 = vector.extract_strided_slice %72 {offsets = [0, 0], sizes = [1, 128], strides = [1, 1]} : vector<1x256xf32> to vector<1x128xf32>
    %74 = vector.extract_strided_slice %72 {offsets = [0, 128], sizes = [1, 128], strides = [1, 1]} : vector<1x256xf32> to vector<1x128xf32>
    %75 = arith.mulf %73, %73 : vector<1x128xf32>
    %76 = arith.subf %74, %75 : vector<1x128xf32>
    %cst_24 = arith.constant 0.000000e+00 : f32
    %77 = vector.broadcast %cst_24 : f32 to vector<1x128xf32>
    %78 = arith.maximumf %76, %77 : vector<1x128xf32>
    %cst_25 = arith.constant 9.99999974E-6 : f32
    %79 = vector.broadcast %cst_25 : f32 to vector<1x128xf32>
    %80 = arith.addf %78, %79 : vector<1x128xf32>
    %81 = math.rsqrt %80 : vector<1x128xf32>
    %82 = arith.mulf %63, %81 : vector<1x128xf32>
    %83 = arith.mulf %73, %82 : vector<1x128xf32>
    %84 = arith.subf %64, %83 : vector<1x128xf32>
    %85 = vector.broadcast %82 : vector<1x128xf32> to vector<16x128xf32>
    %86 = arith.mulf %66, %85 : vector<16x128xf32>
    %87 = vector.broadcast %84 : vector<1x128xf32> to vector<16x128xf32>
    %88 = arith.addf %86, %87 : vector<16x128xf32>
    %cst_26 = arith.constant 0.000000e+00 : f32
    %89 = vector.broadcast %cst_26 : f32 to vector<16x128xf32>
    %90 = arith.maximumf %88, %89 : vector<16x128xf32>
    %91 = arith.truncf %90 : vector<16x128xf32> to vector<16x128xbf16>
    %c0_27 = arith.constant 0 : index
    %c0_28 = arith.constant 0 : index
    %92 = vector.load %arg4[%c0_27, %c0_28] : memref<128x128xbf16, #tpu.memory_space<vmem>>, vector<128x128xbf16>
    %cst_29 = arith.constant dense<0.000000e+00> : vector<16x128xf32>
    %93 = tpu.matmul %91, %92, %cst_29 {dimension_numbers = #tpu.dot_dimension_numbers<[1], [0], [0], [1], [0, 0, 1, 1], [], []>} : vector<16x128xbf16>, vector<128x128xbf16>, vector<16x128xf32> -> vector<16x128xf32>
    %94 = vector.extract_strided_slice %0 {offsets = [6, 0], sizes = [1, 128], strides = [1, 1]} : vector<8x128xf32> to vector<1x128xf32>
    %95 = vector.broadcast %94 : vector<1x128xf32> to vector<16x128xf32>
    %96 = arith.addf %93, %95 : vector<16x128xf32>
    %c0_30 = arith.constant 0 : index
    %c0_31 = arith.constant 0 : index
    %97 = vector.load %arg6[%c0_30, %c0_31] : memref<16x128xf32, #tpu.memory_space<vmem>>, vector<16x128xf32>
    tpu.vector_store %arg6[%c0_30, %c0_31], %96 {strides = array<i32>} : memref<16x128xf32, #tpu.memory_space<vmem>>, vector<16x128xf32>,
    return
  }
}

</mosaic_0001>

<bundles_post_ra>
// kernel: tpu_custom_call.1
= control target key start
LH: loop header
LB: loop body
LE: loop exit
PB: predicated region body
PF: predicated region fallthrough
CT: control target
= control target key end

     0   :  { %11 = vsyncpa [#allocation3], 0  ;;  %s1085_s0 = inlined_call_operand.hbm [shape: f32[16,32], index: 0, kind: input, shape index: {}]   ;;  %s1086_s1 = inlined_call_operand.hbm [shape: bf16[128,128], index: 1, kind: input, shape index: {}]   ;;  %s1087_s2 = inlined_call_operand.hbm [shape: bf16[128,128], index: 2, kind: input, shape index: {}]   ;;  %s1088_s3 = inlined_call_operand.hbm [shape: bf16[128,128], index: 3, kind: input, shape index: {}]   ;;  %s1089_s4 = inlined_call_operand.hbm [shape: bf16[128,128], index: 4, kind: input, shape index: {}]   ;;  %s1090_s5 = inlined_call_operand.hbm [shape: f32[8,128], index: 5, kind: input, shape index: {}]   ;;  %s1091_s6 = inlined_call_operand.hbm [shape: f32[16,128], index: 6, kind: output, shape index: {}]  }
   0x1   :  { %12 = vsyncpa [#allocation6], 0 }
   0x2   :  { %13 = vsyncpa [#allocation9], 0 }
   0x3   :  { %14 = vsyncpa [#allocation12], 0  ;;  %s33_s23 = sshll.u32 %s1086_s1, 4  ;;  %s34_s23 = int_to_ptr.hbm [resolvable:$true] %s33_s23 }
   0x4   :  { %15 = vsyncpa [#allocation4], 0  ;;  %s976_s24 = smov [#allocation5]   ;;  %s59_s28 = sshll.u32 %s1088_s3, 4  ;;  %s60_s28 = int_to_ptr.hbm [resolvable:$true] %s59_s28 }
   0x5   :  { %s35_s25 = sshll.u32 %s976_s24, 4  ;;  %s977_s29 = smov 64   ;;  %s36_s25 = int_to_ptr.vmem [resolvable:$true] %s35_s25 }
   0x6   :  { %s978_s30 = smov 4   ;;  %s979_s7 = smov [#allocation8]  }
   0x7   :  { %41 = dma.hbm_to_vmem [thread:$0]  %s34_s23, 1024, %s36_s25, [#allocation6], %s977_s29, %s977_s29, %s978_s30  }
   0x8   :  { %s61_s8 = sshll.u32 %s979_s7, 4  ;;  %s20_s10 = sshll.u32 %s1085_s0, 4  ;;  %s62_s8 = int_to_ptr.vmem [resolvable:$true] %s61_s8  ;;  %s21_s10 = int_to_ptr.hbm [resolvable:$true] %s20_s10 }
   0x9   :  { %67 = dma.hbm_to_vmem [thread:$0]  %s60_s28, 1024, %s62_s8, [#allocation9], %s977_s29, %s977_s29, %s978_s30  }
   0xa   :  { %s980_s3 = smov [#allocation2]   ;;  %s46_s14 = sshll.u32 %s1087_s2, 4  ;;  %s47_s14 = int_to_ptr.hbm [resolvable:$true] %s46_s14 }
   0xb   :  { %s22_s11 = sshll.u32 %s980_s3, 4  ;;  %s981_s15 = smov 128   ;;  %s23_s11 = int_to_ptr.vmem [resolvable:$true] %s22_s11 }
   0xc   :  { %s982_s16 = smov 8   ;;  %s983_s0 = smov [#allocation7]  }
   0xd   :  { %28 = dma.hbm_to_vmem [thread:$0]  %s21_s10, 256, %s23_s11, [#allocation3], %s981_s15, %s981_s15, %s982_s16  }
   0xe   :  { %s48_s17 = sshll.u32 %s983_s0, 4  ;;  %s72_s20 = sshll.u32 %s1089_s4, 4  ;;  %s49_s17 = int_to_ptr.vmem [resolvable:$true] %s48_s17  ;;  %s73_s20 = int_to_ptr.hbm [resolvable:$true] %s72_s20 }
   0xf   :  { %54 = dma.hbm_to_vmem [thread:$0]  %s47_s14, 1024, %s49_s17, [#allocation6], %s977_s29, %s977_s29, %s978_s30  }
  0x10   :  { %s86_s22 = sshll.u32 %s1090_s5, 4  ;;  %s984_s23 = smov [#allocation10]   ;;  %s87_s22 = int_to_ptr.hbm [resolvable:$true] %s86_s22 }
  0x11   :  { %s74_s24 = sshll.u32 %s984_s23, 4  ;;  %s985_s25 = smov [#allocation11]   ;;  %s75_s24 = int_to_ptr.vmem [resolvable:$true] %s74_s24 }
  0x12   :  { %80 = dma.hbm_to_vmem [thread:$0]  %s73_s20, 1024, %s75_s24, [#allocation9], %s977_s29, %s977_s29, %s978_s30  }
  0x13   :  { %s88_s4 = sshll.u32 %s985_s25, 4  ;;  %s89_s4 = int_to_ptr.vmem [resolvable:$true] %s88_s4 }
  0x14   :  { %91 = dma.hbm_to_vmem [thread:$0]  %s87_s22, 128, %s89_s4, [#allocation12]  }
  0x15   :  { %966 = dma.done.wait [#allocation3], 256  }
  0x16   :  { %967 = vsyncadd [#allocation3], 4294967040 }
  0x17   :  { %968 = dma.done.wait [#allocation6], 2048  }
  0x18   :  { %969 = vsyncadd [#allocation6], 4294965248 }
  0x19   :  { %970 = dma.done.wait [#allocation9], 2048  }
  0x1a   :  { %971 = vsyncadd [#allocation9], 4294965248 }
  0x1b   :  { %972 = dma.done.wait [#allocation12], 128  }
  0x1c   :  { %973 = vsyncadd [#allocation12], 4294967168  ;;  %v753_v0 = vld [vmem:[#allocation5 + $0x38] sm:$0xff]  ;;  %v752_v1 = vld [vmem:[#allocation5 + $0x30] sm:$0xff]  ;;  %vm127_vm0 = vcmask 261120   ;;  %v986_v15 = vmov 16.0  }
  0x1d   :  { %196 = vmatpush.bf16.msra.mxu0 %v753_v0  ;;  %v751_v2 = vld [vmem:[#allocation5 + $0x28] sm:$0xff]  ;;  %v750_v3 = vld [vmem:[#allocation5 + $0x20] sm:$0xff]  ;;  %v749_v4 = vld [vmem:[#allocation5 + $0x18] sm:$0xff]  ;;  %790 = vrcp.f32 %v986_v15  ;;  %s987_s5 = smov [#allocation13]   ;;  %s601_s29 = sshll.u32 %s1091_s6, 4  ;;  %s602_s29 = int_to_ptr.hbm [resolvable:$true] %s601_s29 }
  0x1e   :  { %v748_v5 = vld [vmem:[#allocation5 + $0x10] sm:$0xff]  ;;  %v119_v7 = vld [vmem:[#allocation2 + $0x8] sm:$0xff]  ;;  %v747_v10 = vld [vmem:[#allocation5 + $0x8] sm:$0xff]  ;;  %s599_s26 = sshll.u32 %s987_s5, 4  ;;  %s600_s26 = int_to_ptr.vmem [resolvable:$true] %s599_s26 }
  0x1f   :  { %v118_v6 = vld [vmem:[#allocation2] sm:$0xff]  ;;  %v121_v9 = vpack.c.bf16 %v119_v7, %v119_v7  ;;  %v746_v13 = vld [vmem:[#allocation5] sm:$0xff]  ;;  %v761_v18 = vld [vmem:[#allocation7 + $0x38] sm:$0xff] }
  0x20   :  { %v120_v8 = vpack.c.bf16 %v118_v6, %v118_v6  ;;  %328 = vmatpush.bf16.msra.mxu1 %v761_v18  ;;  %v760_v20 = vld [vmem:[#allocation7 + $0x30] sm:$0xff]  ;;  %v759_v26 = vld [vmem:[#allocation7 + $0x28] sm:$0xff]  ;;  %v758_v32 = vld [vmem:[#allocation7 + $0x20] sm:$0xff] }
  0x21   :  { %197 = vmatpush.bf16.msra.mxu0 %v752_v1  ;;  %v125_v12 = vunpack.c.l.b16 %v121_v9  ;;  %v757_v38 = vld [vmem:[#allocation7 + $0x18] sm:$0xff]  ;;  %v756_v44 = vld [vmem:[#allocation7 + $0x10] sm:$0xff]  ;;  %v755_v49 = vld [vmem:[#allocation7 + $0x8] sm:$0xff] }
  0x22   :  { %v124_v11 = vunpack.c.l.b16 %v120_v8  ;;  %v754_v52 = vld [vmem:[#allocation7] sm:$0xff] }
  0x23   :  { %v791_v17 = vpop.eup %790  ;;  %v1065_v59 = vld [vmem:[#allocation11] sm:$0xff] }
  0x24   :  { %v126_v14 = vpack.c.b16 %v125_v12, %v124_v11  ;;  %v227_v19 = vmul.f32 16.0, %v791_v17  ;;  %329 = vmatpush.bf16.msra.mxu1 %v760_v20  ;;  %vm231_vm1 = vweird.f32 %v791_v17  ;;  %v769_v12 = vld [vmem:[#allocation8 + $0x38] sm:$0xff] }
  0x25   :  { %198 = vmatpush.bf16.msra.mxu0 %v751_v2  ;;  %453 = vmatpush.bf16.msra.mxu2 %v769_v12 }
  0x26   :  { %v228_v22 = vsub.f32 1.0, %v227_v19  ;;  %v767_v19 = vld [vmem:[#allocation8 + $0x28] sm:$0xff] }
  0x28   :  { %v229_v29 = vmul.f32 %v791_v17, %v228_v22  ;;  %330 = vmatpush.bf16.msra.mxu1 %v759_v26 }
  0x29   :  { %199 = vmatpush.bf16.msra.mxu0 %v750_v3 }
  0x2a   :  { %v230_v35 = vadd.f32 %v791_v17, %v229_v29 }
  0x2c   :  { %331 = vmatpush.bf16.msra.mxu1 %v758_v32  ;;  %v1061_v41 = vsel %vm231_vm1, %v791_v17, %v230_v35 }
  0x2d   :  { %200 = vmatpush.bf16.msra.mxu0 %v749_v4 }
  0x30   :  { %332 = vmatpush.bf16.msra.mxu1 %v757_v38  ;;  %v763_v38 = vld [vmem:[#allocation8 + $0x8] sm:$0xff] }
  0x31   :  { %201 = vmatpush.bf16.msra.mxu0 %v748_v5 }
  0x34   :  { %333 = vmatpush.bf16.msra.mxu1 %v756_v44 }
  0x35   :  { %202 = vmatpush.bf16.msra.mxu0 %v747_v10 }
  0x38   :  { %334 = vmatpush.bf16.msra.mxu1 %v755_v49 }
  0x39   :  { %203 = vmatpush.bf16.msra.mxu0 %v746_v13  ;;  %v768_v13 = vld [vmem:[#allocation8 + $0x30] sm:$0xff] }
  0x3a   :  { %454 = vmatpush.bf16.msra.mxu2 %v768_v13  ;;  %v774_v13 = vld [vmem:[#allocation10 + $0x20] sm:$0xff] }
  0x3c   :  { %649 = vmatmul.msk.bf16.vlgmr.msra.gmra.mxu0 %vm127_vm0, %v126_v14  ;;  %335 = vmatpush.bf16.msra.mxu1 %v754_v52 }
  0x3e   :  { %455 = vmatpush.bf16.msra.mxu2 %v767_v19  ;;  %v773_v19 = vld [vmem:[#allocation10 + $0x18] sm:$0xff] }
  0xb9   :  { %v1056_v16 = vpop.f32.mrf.mxu0 }
  0xba   :  { %v210_v23 = vmul.f32 %v1056_v16, %v1056_v16 }
  0xc1   :  { %v207_v21 = vpop.f32.mrf.mxu0 }
  0xc2   :  { %v211_v24 = vmul.f32 %v207_v21, %v207_v21  ;;  %v212_v25 = vadd.f32 %v207_v21, %v1056_v16 }
  0xc4   :  { %v213_v27 = vrot.slane %v212_v25, 4  ;;  %v219_v28 = vadd.f32 %v211_v24, %v210_v23  ;;  %v766_v23 = vld [vmem:[#allocation8 + $0x20] sm:$0xff] }
  0xc5   :  { %456 = vmatpush.bf16.msra.mxu2 %v766_v23  ;;  %v772_v23 = vld [vmem:[#allocation10 + $0x10] sm:$0xff] }
  0xc6   :  { %v214_v30 = vadd.f32 %v213_v27, %v212_v25  ;;  %v220_v31 = vrot.slane %v219_v28, 4 }
  0xc8   :  { %v215_v33 = vrot.slane %v214_v30, 2  ;;  %v221_v34 = vadd.f32 %v220_v31, %v219_v28  ;;  %v765_v28 = vld [vmem:[#allocation8 + $0x18] sm:$0xff] }
  0xc9   :  { %457 = vmatpush.bf16.msra.mxu2 %v765_v28  ;;  %v771_v28 = vld [vmem:[#allocation10 + $0x8] sm:$0xff] }
  0xca   :  { %v216_v36 = vadd.f32 %v215_v33, %v214_v30  ;;  %v222_v37 = vrot.slane %v221_v34, 2  ;;  %v764_v33 = vld [vmem:[#allocation8 + $0x10] sm:$0xff] }
  0xcc   :  { %v217_v39 = vrot.slane %v216_v36, 1  ;;  %v223_v40 = vadd.f32 %v222_v37, %v221_v34 }
  0xcd   :  { %458 = vmatpush.bf16.msra.mxu2 %v764_v33 }
  0xce   :  { %v218_v42 = vadd.f32 %v217_v39, %v216_v36  ;;  %v224_v43 = vrot.slane %v223_v40, 1 }
  0xd0   :  { %v225_v45 = vadd.f32 %v224_v43, %v223_v40  ;;  %v233_v46 = vmul.f32 %v1061_v41, %v218_v42  ;;  %v762_v42 = vld [vmem:[#allocation8] sm:$0xff] }
  0xd1   :  { %459 = vmatpush.bf16.msra.mxu2 %v763_v38 }
  0xd2   :  { %v234_v47 = vmul.f32 %v1061_v41, %v225_v45  ;;  %v235_v48 = vmul.f32 %v233_v46, %v233_v46 }
  0xd4   :  { %v236_v50 = vsub.f32 %v234_v47, %v235_v48 }
  0xd5   :  { %460 = vmatpush.bf16.msra.mxu2 %v762_v42 }
  0xd6   :  { %v237_v51 = vmax.f32 %v236_v50, 0.0 }
  0xd8   :  { %v238_v53 = vadd.f32 1e-05, %v237_v51 }
  0xda   :  { %792 = vrsqrt.f32 %v238_v53  ;;  %vm245_vm3 = vweird.f32 %v238_v53 }
  0xe0   :  { %v793_v54 = vpop.eup %792 }
  0xe1   :  { %v240_v55 = vmul.f32 %v793_v54, %v238_v53  ;;  %vm246_vm2 = vweird.f32 %v793_v54 }
  0xe2   :  { %vm247_vm4 = vmor %vm245_vm3, %vm246_vm2 }
  0xe3   :  { %v241_v56 = vmul.f32 %v793_v54, %v240_v55 }
  0xe5   :  { %v242_v57 = vmul.f32 0.5, %v241_v56 }
  0xe7   :  { %v243_v58 = vsub.f32 1.5, %v242_v57 }
  0xe9   :  { %v244_v60 = vmul.f32 %v793_v54, %v243_v58 }
  0xeb   :  { %v248_v61 = vsel %vm247_vm4, %v793_v54, %v244_v60 }
  0xec   :  { %v249_v62 = vmul.f32 %v248_v61, %v1065_v59 }
  0xee   :  { %v250_v63 = vmul.f32 %v249_v62, %v233_v46  ;;  %v255_v1 = vperm.slane %v249_v62, 0 }
  0xf0   :  { %v252_v0 = vrot.slane %v250_v63, 7  ;;  %v256_v3 = vmul.f32 %v255_v1, %v1056_v16  ;;  %v257_v4 = vmul.f32 %v255_v1, %v207_v21 }
  0xf2   :  { %v254_v2 = vsub.f32 %v1065_v59, %v252_v0 }
  0xf4   :  { %v258_v5 = vperm.slane %v254_v2, 1  ;;  %v777_v2 = vld [vmem:[#allocation10 + $0x38] sm:$0xff] }
  0xf5   :  { %579 = vmatpush.bf16.msra.mxu3 %v777_v2 }
  0xf6   :  { %v260_v6 = vadd.f32 %v258_v5, %v257_v4  ;;  %v259_v7 = vadd.f32 %v258_v5, %v256_v3  ;;  %v776_v3 = vld [vmem:[#allocation10 + $0x30] sm:$0xff] }
  0xf8   :  { %v261_v8 = vmax.f32 %v259_v7, 0.0  ;;  %v262_v9 = vmax.f32 %v260_v6, 0.0 }
  0xf9   :  { %580 = vmatpush.bf16.msra.mxu3 %v776_v3 }
  0xfa   :  { %v263_v10 = vpack.c.bf16 %v262_v9, %v261_v8  ;;  %v775_v8 = vld [vmem:[#allocation10 + $0x28] sm:$0xff] }
  0xfc   :  { %336 = vmatmul.bf16.vlgmr.msra.gmra.mxu1 %v263_v10 }
  0xfd   :  { %581 = vmatpush.bf16.msra.mxu3 %v775_v8 }
 0x101   :  { %582 = vmatpush.bf16.msra.mxu3 %v774_v13 }
 0x105   :  { %583 = vmatpush.bf16.msra.mxu3 %v773_v19 }
 0x109   :  { %584 = vmatpush.bf16.msra.mxu3 %v772_v23 }
 0x10d   :  { %585 = vmatpush.bf16.msra.mxu3 %v771_v28 }
 0x179   :  { %v337_v11 = vpop.f32.mrf.mxu1 }
 0x17a   :  { %v342_v15 = vmul.f32 %v337_v11, %v337_v11 }
 0x181   :  { %v339_v14 = vpop.f32.mrf.mxu1 }
 0x182   :  { %v343_v17 = vmul.f32 %v339_v14, %v339_v14  ;;  %v344_v18 = vadd.f32 %v339_v14, %v337_v11 }
 0x184   :  { %v345_v20 = vrot.slane %v344_v18, 4  ;;  %v351_v16 = vadd.f32 %v343_v17, %v342_v15 }
 0x186   :  { %v346_v21 = vadd.f32 %v345_v20, %v344_v18  ;;  %v352_v22 = vrot.slane %v351_v16, 4 }
 0x188   :  { %v347_v24 = vrot.slane %v346_v21, 2  ;;  %v353_v25 = vadd.f32 %v352_v22, %v351_v16 }
 0x18a   :  { %v348_v26 = vadd.f32 %v347_v24, %v346_v21  ;;  %v354_v27 = vrot.slane %v353_v25, 2 }
 0x18c   :  { %v349_v29 = vrot.slane %v348_v26, 1  ;;  %v355_v30 = vadd.f32 %v354_v27, %v353_v25 }
 0x18e   :  { %v350_v31 = vadd.f32 %v349_v29, %v348_v26  ;;  %v356_v32 = vrot.slane %v355_v30, 1 }
 0x190   :  { %v357_v34 = vadd.f32 %v356_v32, %v355_v30  ;;  %v358_v35 = vmul.f32 %v350_v31, %v1061_v41  ;;  %v770_v31 = vld [vmem:[#allocation10] sm:$0xff] }
 0x191   :  { %586 = vmatpush.bf16.msra.mxu3 %v770_v31 }
 0x192   :  { %v359_v36 = vmul.f32 %v357_v34, %v1061_v41  ;;  %v360_v37 = vmul.f32 %v358_v35, %v358_v35 }
 0x194   :  { %v361_v39 = vsub.f32 %v359_v36, %v360_v37 }
 0x196   :  { %v362_v40 = vmax.f32 %v361_v39, 0.0 }
 0x198   :  { %v363_v43 = vadd.f32 1e-05, %v362_v40 }
 0x19a   :  { %794 = vrsqrt.f32 %v363_v43  ;;  %vm370_vm6 = vweird.f32 %v363_v43 }
 0x1a0   :  { %v795_v44 = vpop.eup %794 }
 0x1a1   :  { %v365_v45 = vmul.f32 %v795_v44, %v363_v43  ;;  %vm371_vm5 = vweird.f32 %v795_v44 }
 0x1a2   :  { %vm372_vm7 = vmor %vm370_vm6, %vm371_vm5 }
 0x1a3   :  { %v366_v46 = vmul.f32 %v795_v44, %v365_v45 }
 0x1a5   :  { %v367_v47 = vmul.f32 0.5, %v366_v46 }
 0x1a7   :  { %v368_v48 = vsub.f32 1.5, %v367_v47 }
 0x1a9   :  { %v369_v49 = vmul.f32 %v795_v44, %v368_v48 }
 0x1ab   :  { %v373_v50 = vsel %vm372_vm7, %v795_v44, %v369_v49 }
 0x1ac   :  { %v374_v51 = vmul.f32 %v373_v50, %v1065_v59 }
 0x1ae   :  { %v375_v52 = vmul.f32 %v374_v51, %v358_v35  ;;  %v380_v54 = vperm.slane %v374_v51, 2 }
 0x1b0   :  { %v377_v53 = vrot.slane %v375_v52, 7  ;;  %v381_v56 = vmul.f32 %v380_v54, %v337_v11  ;;  %v382_v57 = vmul.f32 %v380_v54, %v339_v14 }
 0x1b2   :  { %v379_v55 = vsub.f32 %v1065_v59, %v377_v53  ;;  %v530_v53 = vperm.slane %v1065_v59, 6 }
 0x1b4   :  { %v383_v58 = vperm.slane %v379_v55, 3 }
 0x1b6   :  { %v385_v60 = vadd.f32 %v383_v58, %v382_v57  ;;  %v384_v61 = vadd.f32 %v383_v58, %v381_v56 }
 0x1b8   :  { %v386_v62 = vmax.f32 %v384_v61, 0.0  ;;  %v387_v63 = vmax.f32 %v385_v60, 0.0 }
 0x1ba   :  { %v388_v0 = vpack.c.bf16 %v387_v63, %v386_v62 }
 0x1bc   :  { %461 = vmatmul.bf16.vlgmr.msra.gmra.mxu2 %v388_v0 }
 0x23f   :  { %v462_v1 = vpop.f32.mrf.mxu2 }
 0x240   :  { %v467_v5 = vmul.f32 %v462_v1, %v462_v1 }
 0x247   :  { %v464_v4 = vpop.f32.mrf.mxu2 }
 0x248   :  { %v468_v6 = vmul.f32 %v464_v4, %v464_v4  ;;  %v469_v7 = vadd.f32 %v464_v4, %v462_v1 }
 0x24a   :  { %v470_v9 = vrot.slane %v469_v7, 4  ;;  %v476_v10 = vadd.f32 %v468_v6, %v467_v5 }
 0x24c   :  { %v471_v11 = vadd.f32 %v470_v9, %v469_v7  ;;  %v477_v12 = vrot.slane %v476_v10, 4 }
 0x24e   :  { %v472_v14 = vrot.slane %v471_v11, 2  ;;  %v478_v15 = vadd.f32 %v477_v12, %v476_v10 }
 0x250   :  { %v473_v17 = vadd.f32 %v472_v14, %v471_v11  ;;  %v479_v18 = vrot.slane %v478_v15, 2 }
 0x252   :  { %v474_v20 = vrot.slane %v473_v17, 1  ;;  %v480_v16 = vadd.f32 %v479_v18, %v478_v15 }
 0x254   :  { %v475_v21 = vadd.f32 %v474_v20, %v473_v17  ;;  %v481_v22 = vrot.slane %v480_v16, 1 }
 0x256   :  { %v482_v24 = vadd.f32 %v481_v22, %v480_v16  ;;  %v483_v25 = vmul.f32 %v475_v21, %v1061_v41 }
 0x258   :  { %v484_v26 = vmul.f32 %v482_v24, %v1061_v41  ;;  %v485_v27 = vmul.f32 %v483_v25, %v483_v25 }
 0x25a   :  { %v486_v29 = vsub.f32 %v484_v26, %v485_v27 }
 0x25c   :  { %v487_v30 = vmax.f32 %v486_v29, 0.0 }
 0x25e   :  { %v488_v32 = vadd.f32 1e-05, %v487_v30 }
 0x260   :  { %796 = vrsqrt.f32 %v488_v32  ;;  %vm495_vm9 = vweird.f32 %v488_v32 }
 0x266   :  { %v797_v33 = vpop.eup %796 }
 0x267   :  { %v490_v34 = vmul.f32 %v797_v33, %v488_v32  ;;  %vm496_vm8 = vweird.f32 %v797_v33 }
 0x268   :  { %vm497_vm10 = vmor %vm495_vm9, %vm496_vm8 }
 0x269   :  { %v491_v35 = vmul.f32 %v797_v33, %v490_v34 }
 0x26b   :  { %v492_v36 = vmul.f32 0.5, %v491_v35 }
 0x26d   :  { %v493_v37 = vsub.f32 1.5, %v492_v36 }
 0x26f   :  { %v494_v38 = vmul.f32 %v797_v33, %v493_v37 }
 0x271   :  { %v498_v39 = vsel %vm497_vm10, %v797_v33, %v494_v38 }
 0x272   :  { %v499_v41 = vmul.f32 %v498_v39, %v1065_v59 }
 0x274   :  { %v500_v40 = vmul.f32 %v499_v41, %v483_v25  ;;  %v505_v43 = vperm.slane %v499_v41, 4 }
 0x276   :  { %v502_v42 = vrot.slane %v500_v40, 7  ;;  %v506_v45 = vmul.f32 %v505_v43, %v462_v1  ;;  %v507_v46 = vmul.f32 %v505_v43, %v464_v4 }
 0x278   :  { %v504_v44 = vsub.f32 %v1065_v59, %v502_v42 }
 0x27a   :  { %v508_v47 = vperm.slane %v504_v44, 5 }
 0x27c   :  { %v510_v48 = vadd.f32 %v508_v47, %v507_v46  ;;  %v509_v49 = vadd.f32 %v508_v47, %v506_v45 }
 0x27e   :  { %v511_v50 = vmax.f32 %v509_v49, 0.0  ;;  %v512_v51 = vmax.f32 %v510_v48, 0.0 }
 0x280   :  { %v513_v52 = vpack.c.bf16 %v512_v51, %v511_v50 }
 0x282   :  { %587 = vmatmul.bf16.vlgmr.msra.gmra.mxu3 %v513_v52 }
 0x305   :  { %v588_v54 = vpop.f32.mrf.mxu3 }
 0x306   :  { %v589_v55 = vadd.f32 %v588_v54, %v530_v53 }
 0x308   :  { %593 = vst [vmem:[#allocation13] sm:$0xff] %v589_v55 }
 0x30d   :  { %v590_v56 = vpop.f32.mrf.mxu3 }
 0x30e   :  { %v591_v57 = vadd.f32 %v590_v56, %v530_v53 }
 0x310   :  { %594 = vst [vmem:[#allocation13 + $0x8] sm:$0xff] %v591_v57 }
 0x311   :  { %607 = dma.vmem_to_hbm [thread:$0]  %s600_s26, 256, %s602_s29, [#allocation4], %s981_s15, %s981_s15, %s982_s16  }
 0x312   :  { %974 = dma.done.wait [#allocation4], 256  }
 0x313   :  { %975 = vsyncadd [#allocation4], 4294967040 }
 0x314   :  { %612 = vsyncpa [#allocation3], 1 }
 0x315   :  { %613 = vsyncpa [#allocation6], 1 }
 0x316   :  { %614 = vsyncpa [#allocation9], 1 }
 0x317   :  { %615 = vsyncpa [#allocation12], 1 }
 0x318   :  { %616 = vsyncpa [#allocation4], 1 }

</bundles_post_ra>
